<compile_context>
chip_gen: v5e
topology: v5e:2x2
jax: 0.10.0
libtpu: 0.0.40
codegen_flags: <defaults>
</compile_context>

<pallas_src>
import jax
import jax.numpy as jnp
from jax.experimental import pallas as pl
from jax.experimental.pallas import tpu as pltpu

SPLIT_SIZES = (1, 2, 3, 4)


def _clone_kernel(x_ref, o_ref):
    # Single full-array block copy (the torch .clone()).
    o_ref[...] = x_ref[...]


def pallas_clone(x):
    """Full-tensor copy (torch .clone()) as a single full-array-block Pallas kernel."""
    nbytes = x.size * jnp.dtype(x.dtype).itemsize
    return pl.pallas_call(
        _clone_kernel,
        out_shape=jax.ShapeDtypeStruct(x.shape, x.dtype),
        # Whole array as one VMEM block: no grid, no wrapper reshape/pad.
        in_specs=[pl.BlockSpec(memory_space=pltpu.MemorySpace.VMEM)],
        out_specs=pl.BlockSpec(memory_space=pltpu.MemorySpace.VMEM),
        # Tell XLA this custom call is trivially cheap (read + write only).
        cost_estimate=pl.CostEstimate(
            flops=0, transcendentals=0, bytes_accessed=2 * nbytes
        ),
    )(x)


@jax.jit
def _forward_core(x1):
    """clone + channel split, fused under a single jit dispatch."""
    v1 = pallas_clone(x1)
    # torch.split(v1, [1, 2, 3, 4], dim=1) -> channel slices (glue, plain JAX)
    splits = []
    off = 0
    for s in SPLIT_SIZES:
        splits.append(jax.lax.slice_in_dim(v1, off, off + s, axis=1))
        off += s
    return v1, tuple(splits)


def model_forward(x1):
    """Reproduces Model.forward: clone, split along channel dim, return True."""
    v1, (v2, v3, v4, v5) = _forward_core(x1)
    # The PyTorch module returns True; we also return the clone + splits so
    # the kernel result can be validated.
    return True, v1, (v2, v3, v4, v5)


if __name__ == "__main__":
    key = jax.random.PRNGKey(0)
    C = sum(SPLIT_SIZES)  # 10
    x1 = jax.random.normal(key, (1, C, 8, 8), dtype=jnp.float32)

    result, v1, (v2, v3, v4, v5) = model_forward(x1)
    jax.block_until_ready(v1)

    # Sanity checks: clone matches input, splits have correct shapes and values.
    assert result is True
    assert v1.shape == x1.shape
    assert jnp.allclose(v1, x1)
    off = 0
    for piece, s in zip((v2, v3, v4, v5), SPLIT_SIZES):
        assert piece.shape == (1, s, 8, 8)
        assert jnp.allclose(piece, x1[:, off:off + s])
        off += s

    print("KERNEL_OK")
</pallas_src>

<mosaic_0001>
module attributes {stable_mosaic.version = 11 : i64} {
  func.func @_clone_kernel(%arg0: memref<1x10x8x8xf32, #tpu.memory_space<vmem>>, %arg1: memref<1x10x8x8xf32, #tpu.memory_space<vmem>>) attributes {dimension_semantics = [], scalar_prefetch = 0 : i64, scratch_operands = 0 : i64, tpu.core_type = #tpu.core_type<tc>} {
    %c0 = arith.constant 0 : index
    %c0_0 = arith.constant 0 : index
    %c0_1 = arith.constant 0 : index
    %c0_2 = arith.constant 0 : index
    %0 = vector.load %arg0[%c0, %c0_0, %c0_1, %c0_2] : memref<1x10x8x8xf32, #tpu.memory_space<vmem>>, vector<1x10x8x8xf32>
    %c0_3 = arith.constant 0 : index
    %c0_4 = arith.constant 0 : index
    %c0_5 = arith.constant 0 : index
    %c0_6 = arith.constant 0 : index
    %1 = vector.load %arg1[%c0_3, %c0_4, %c0_5, %c0_6] : memref<1x10x8x8xf32, #tpu.memory_space<vmem>>, vector<1x10x8x8xf32>
    tpu.vector_store %arg1[%c0_3, %c0_4, %c0_5, %c0_6], %0 {strides = array<i32>} : memref<1x10x8x8xf32, #tpu.memory_space<vmem>>, vector<1x10x8x8xf32>,
    return
  }
}

</mosaic_0001>

<bundles_post_ra>
// kernel: _forward_core.1
= control target key start
LH: loop header
LB: loop body
LE: loop exit
PB: predicated region body
PF: predicated region fallthrough
CT: control target
= control target key end

     0   :  { %vm18_vm0 = vcmask 64512   ;;  %s113_s0 = inlined_call_operand.vmem [shape: f32[1,10,8,8], index: 0, kind: input, shape index: {}]   ;;  %s114_s1 = inlined_call_operand.vmem [shape: f32[1,10,8,8], index: 1, kind: output, shape index: {}]  }
   0x1   :  { %v8_v0 = vld [vmem:[%s113_s0] sm:$0xff]  ;;  %v9_v1 = vld [vmem:[%s113_s0 + $0x8] sm:$0xff]  ;;  %v10_v2 = vld [vmem:[%s113_s0 + $0x10] sm:$0xff] }
   0x2   :  { %19 = vst.msk [vmem:[%s114_s1] sm:$0xff] %vm18_vm0, %v8_v0  ;;  %v11_v3 = vld [vmem:[%s113_s0 + $0x18] sm:$0xff]  ;;  %v12_v4 = vld [vmem:[%s113_s0 + $0x20] sm:$0xff]  ;;  %v13_v5 = vld [vmem:[%s113_s0 + $0x28] sm:$0xff] }
   0x3   :  { %20 = vst.msk [vmem:[%s114_s1 + $0x8] sm:$0xff] %vm18_vm0, %v9_v1  ;;  %v14_v6 = vld [vmem:[%s113_s0 + $0x30] sm:$0xff]  ;;  %v15_v7 = vld [vmem:[%s113_s0 + $0x38] sm:$0xff]  ;;  %v16_v8 = vld [vmem:[%s113_s0 + $0x40] sm:$0xff] }
   0x4   :  { %21 = vst.msk [vmem:[%s114_s1 + $0x10] sm:$0xff] %vm18_vm0, %v10_v2  ;;  %v17_v9 = vld [vmem:[%s113_s0 + $0x48] sm:$0xff] }
   0x5   :  { %22 = vst.msk [vmem:[%s114_s1 + $0x18] sm:$0xff] %vm18_vm0, %v11_v3 }
   0x6   :  { %23 = vst.msk [vmem:[%s114_s1 + $0x20] sm:$0xff] %vm18_vm0, %v12_v4 }
   0x7   :  { %24 = vst.msk [vmem:[%s114_s1 + $0x28] sm:$0xff] %vm18_vm0, %v13_v5 }
   0x8   :  { %25 = vst.msk [vmem:[%s114_s1 + $0x30] sm:$0xff] %vm18_vm0, %v14_v6 }
   0x9   :  { %26 = vst.msk [vmem:[%s114_s1 + $0x38] sm:$0xff] %vm18_vm0, %v15_v7 }
   0xa   :  { %27 = vst.msk [vmem:[%s114_s1 + $0x40] sm:$0xff] %vm18_vm0, %v16_v8 }
   0xb   :  { %28 = vst.msk [vmem:[%s114_s1 + $0x48] sm:$0xff] %vm18_vm0, %v17_v9 }

</bundles_post_ra>
